<compile_context>
chip_gen: v7x
topology: tpu7x:2x2x1
jax: 0.10.0
libtpu: 0.0.40
codegen_flags: <defaults>
</compile_context>

<pallas_src>
import functools

import jax
import jax.numpy as jnp
import numpy as np
from jax.experimental import pallas as pl
from jax.experimental.pallas import tpu as pltpu


def encoder_kernel(x_ref,      # (B, T, D)   input_data
                   wx_ref,     # (1, T, 1)   attn weight, time-series part
                   wih_ref,    # (D, 4H)     W_ih^T
                   whh_ref,    # (H, 4H)     W_hh^T
                   bl_ref,     # (1, 4H)     LSTM bias (b_ih + b_hh)
                   out_w_ref,  # (B, D, T)   input_weighted (PyTorch layout)
                   out_e_ref,  # (B, D, H)   input_encoded  (PyTorch layout)
                   *, t_loop):
    B, T, D = x_ref.shape
    H = whh_ref.shape[0]

    x = x_ref[...]
    w_x = wx_ref[...]
    wih = wih_ref[...]
    whh = whh_ref[...]
    b_lstm = bl_ref[...]

    # ---- attention, hoisted out of the recurrence --------------------------
    # attn_linear input is [h ; c ; x_history_d].  h and c are broadcast
    # identically over the D driving series (hidden.repeat in the PyTorch
    # code), so their contribution + bias is a per-row constant that cancels
    # inside softmax over d.  Attention weights are therefore time-invariant.
    score = jnp.sum(x * w_x, axis=1)                         # (B, D)
    score = score - jnp.max(score, axis=1, keepdims=True)
    p = jnp.exp(score)
    attn = p / jnp.sum(p, axis=1, keepdims=True)             # (B, D), exact

    # ---- weighted inputs + input-gate projections, hoisted -----------------
    # Neither depends on h/c, so they are computed before the serial loop and
    # pipeline freely through the VPU/MXU.
    w_steps = [attn * x[:, t, :] for t in range(t_loop)]     # each (B, D)
    xg_steps = [jnp.dot(w_t, wih, preferred_element_type=jnp.float32) + b_lstm
                for w_t in w_steps]                          # each (B, 4H)

    # ---- serial LSTM recurrence (fully unrolled, static trip count) --------
    h = jnp.zeros((B, H), jnp.float32)
    c = jnp.zeros((B, H), jnp.float32)
    h_steps = []
    for t in range(t_loop):
        gates = xg_steps[t] + jnp.dot(h, whh,
                                      preferred_element_type=jnp.float32)  # (B, 4H)
        sig = jax.nn.sigmoid(gates)   # one EUP pass over the full gates vreg
        th = jnp.tanh(gates)          # one EUP pass over the full gates vreg
        i_g = sig[:, 0 * H:1 * H]
        f_g = sig[:, 1 * H:2 * H]
        g_g = th[:, 2 * H:3 * H]
        o_g = sig[:, 3 * H:4 * H]
        c = f_g * c + i_g * g_g
        h = o_g * jnp.tanh(c)
        h_steps.append(h)

    # ---- bulk stores directly in the PyTorch output layouts ----------------
    # Positions past t_loop stay zero (matching the pre-allocated zero tensors).
    for b in range(B):
        # input_weighted[b]: (D, T); column t = weighted_t[b]
        w_td = jnp.concatenate([w[b:b + 1, :] for w in w_steps], axis=0)   # (t_loop, D)
        w_dt = w_td.T                                                      # (D, t_loop)
        if t_loop < T:
            w_dt = jnp.concatenate(
                [w_dt, jnp.zeros((D, T - t_loop), jnp.float32)], axis=1)
        out_w_ref[b] = w_dt

        # input_encoded[b]: (D, H); row t = h_t[b]
        e_th = jnp.concatenate([hs[b:b + 1, :] for hs in h_steps], axis=0)  # (t_loop, H)
        if t_loop < D:
            e_th = jnp.concatenate(
                [e_th, jnp.zeros((D - t_loop, H), jnp.float32)], axis=0)
        out_e_ref[b] = e_th


def encoder_forward(input_data, params):
    """Pallas Encoder forward.

    input_data: (B, T_seq, input_size)  float32
    returns (input_weighted (B, input_size, T_seq),
             input_encoded  (B, input_size, hidden_size))
    """
    B, T, D = input_data.shape
    H = params["w_hh_t"].shape[0]
    t_loop = min(T, D)   # min(input_data.shape[1], input_encoded.shape[1]) — PyTorch quirk

    vmem = pl.BlockSpec(memory_space=pltpu.MemorySpace.VMEM)
    kernel = functools.partial(encoder_kernel, t_loop=t_loop)

    # TODO(synk): for large batches, add a batch grid axis with
    # dimension_semantics=("parallel",) (2 TensorCores on v7x) and tile VMEM
    # against the 64 MiB v7x budget; at B=2 the gridless whole-array-in-VMEM
    # form is optimal.
    out_w, out_e = pl.pallas_call(
        kernel,
        out_shape=(jax.ShapeDtypeStruct((B, D, T), jnp.float32),   # input_weighted
                   jax.ShapeDtypeStruct((B, D, H), jnp.float32)),  # input_encoded
        in_specs=[vmem] * 5,
        out_specs=(vmem, vmem),
    )(input_data, params["w_x"], params["w_ih_t"], params["w_hh_t"],
      params["b_lstm"])
    return out_w, out_e


def make_params(key, input_size, input_size_attn, hidden_size):
    """Deterministic parameter init mirroring PyTorch nn.LSTM / nn.Linear defaults."""
    H, D, T = hidden_size, input_size, input_size_attn
    ks = jax.random.split(key, 6)

    k_lstm = 1.0 / np.sqrt(H)
    w_ih = jax.random.uniform(ks[0], (4 * H, D), jnp.float32, -k_lstm, k_lstm)
    w_hh = jax.random.uniform(ks[1], (4 * H, H), jnp.float32, -k_lstm, k_lstm)
    b_ih = jax.random.uniform(ks[2], (4 * H,), jnp.float32, -k_lstm, k_lstm)
    b_hh = jax.random.uniform(ks[3], (4 * H,), jnp.float32, -k_lstm, k_lstm)

    in_feat = 2 * H + T
    k_lin = 1.0 / np.sqrt(in_feat)
    attn_w = jax.random.uniform(ks[4], (1, in_feat), jnp.float32, -k_lin, k_lin)
    attn_b = jax.random.uniform(ks[5], (1,), jnp.float32, -k_lin, k_lin)

    return {
        # attention linear: [w_h | w_c | w_x], bias
        "w_h": attn_w[:, :H],                                   # (1, H)   (reference only)
        "w_c": attn_w[:, H:2 * H],                              # (1, H)   (reference only)
        "w_x": attn_w[:, 2 * H:].reshape(1, T, 1),              # (1, T, 1)
        "b_attn": attn_b.reshape(1, 1),                         # (1, 1)   (reference only)
        # LSTM (PyTorch gate order i, f, g, o)
        "w_ih_t": w_ih.T,                                       # (D, 4H)
        "w_hh_t": w_hh.T,                                       # (H, 4H)
        "b_lstm": (b_ih + b_hh).reshape(1, 4 * H),              # (1, 4H)
    }


def encoder_reference(x, p):
    """Pure-JAX reference with the full (un-cancelled) attention computation."""
    B, T, D = x.shape
    H = p["w_hh_t"].shape[0]
    hp = jax.lax.Precision.HIGHEST
    h = jnp.zeros((B, H), jnp.float32)
    c = jnp.zeros((B, H), jnp.float32)
    out_w = jnp.zeros((B, D, T), jnp.float32)
    out_e = jnp.zeros((B, D, H), jnp.float32)
    score_x = jnp.einsum("btd,t->bd", x, p["w_x"][0, :, 0], precision=hp)
    for t in range(min(T, D)):
        s_hc = h @ p["w_h"][0] + c @ p["w_c"][0] + p["b_attn"][0, 0]
        e = score_x + s_hc[:, None]
        attn = jax.nn.softmax(e, axis=1)
        weighted = attn * x[:, t, :]
        gates = (jnp.dot(weighted, p["w_ih_t"], precision=hp)
                 + jnp.dot(h, p["w_hh_t"], precision=hp) + p["b_lstm"][0])
        i = jax.nn.sigmoid(gates[:, :H])
        f = jax.nn.sigmoid(gates[:, H:2 * H])
        g = jnp.tanh(gates[:, 2 * H:3 * H])
        o = jax.nn.sigmoid(gates[:, 3 * H:])
        c = f * c + i * g
        h = o * jnp.tanh(c)
        out_w = out_w.at[:, :, t].set(weighted)
        out_e = out_e.at[:, t, :].set(h)
    return out_w, out_e


if __name__ == "__main__":
    # Small shapes consistent with the module:
    #   input_size (driving series) D = 8, seq length T_seq = input_size_attn = 10,
    #   hidden_size H = 32, batch B = 2.
    B, T_seq, D, H = 2, 10, 8, 32

    key = jax.random.PRNGKey(0)
    k_x, k_p = jax.random.split(key)
    input_data = jax.random.normal(k_x, (B, T_seq, D), dtype=jnp.float32)
    params = make_params(k_p, input_size=D, input_size_attn=T_seq, hidden_size=H)

    fwd = jax.jit(encoder_forward)
    input_weighted, input_encoded = fwd(input_data, params)
    jax.block_until_ready((input_weighted, input_encoded))

    ref_w, ref_e = encoder_reference(input_data, params)
    assert input_weighted.shape == (B, D, T_seq)
    assert input_encoded.shape == (B, D, H)
    # Conservative tolerances (cover MXU f32 pass rounding); genuine layout /
    # gate-order / recurrence bugs produce O(0.1 - 1) errors.
    np.testing.assert_allclose(np.asarray(input_weighted), np.asarray(ref_w),
                               rtol=5e-3, atol=2e-3)
    np.testing.assert_allclose(np.asarray(input_encoded), np.asarray(ref_e),
                               rtol=5e-3, atol=2e-3)

    print("KERNEL_OK")
</pallas_src>

<mosaic_0001>
module attributes {stable_mosaic.version = 11 : i64} {
  func.func @encoder_kernel(%arg0: memref<2x10x8xf32, #tpu.memory_space<vmem>>, %arg1: memref<1x10x1xf32, #tpu.memory_space<vmem>>, %arg2: memref<8x128xf32, #tpu.memory_space<vmem>>, %arg3: memref<32x128xf32, #tpu.memory_space<vmem>>, %arg4: memref<1x128xf32, #tpu.memory_space<vmem>>, %arg5: memref<2x8x10xf32, #tpu.memory_space<vmem>>, %arg6: memref<2x8x32xf32, #tpu.memory_space<vmem>>) attributes {dimension_semantics = [], scalar_prefetch = 0 : i64, scratch_operands = 0 : i64, tpu.core_type = #tpu.core_type<tc>} {
    %c0 = arith.constant 0 : index
    %c0_0 = arith.constant 0 : index
    %c0_1 = arith.constant 0 : index
    %0 = vector.load %arg0[%c0, %c0_0, %c0_1] : memref<2x10x8xf32, #tpu.memory_space<vmem>>, vector<2x10x8xf32>
    %c0_2 = arith.constant 0 : index
    %c0_3 = arith.constant 0 : index
    %c0_4 = arith.constant 0 : index
    %1 = vector.load %arg1[%c0_2, %c0_3, %c0_4] : memref<1x10x1xf32, #tpu.memory_space<vmem>>, vector<1x10x1xf32>
    %c0_5 = arith.constant 0 : index
    %c0_6 = arith.constant 0 : index
    %2 = vector.load %arg2[%c0_5, %c0_6] : memref<8x128xf32, #tpu.memory_space<vmem>>, vector<8x128xf32>
    %c0_7 = arith.constant 0 : index
    %c0_8 = arith.constant 0 : index
    %3 = vector.load %arg3[%c0_7, %c0_8] : memref<32x128xf32, #tpu.memory_space<vmem>>, vector<32x128xf32>
    %c0_9 = arith.constant 0 : index
    %c0_10 = arith.constant 0 : index
    %4 = vector.load %arg4[%c0_9, %c0_10] : memref<1x128xf32, #tpu.memory_space<vmem>>, vector<1x128xf32>
    %5 = vector.broadcast %1 : vector<1x10x1xf32> to vector<2x10x8xf32>
    %6 = arith.mulf %0, %5 : vector<2x10x8xf32>
    %cst = arith.constant dense<0.000000e+00> : vector<2x8xf32>
    %7 = vector.multi_reduction <add>, %6, %cst [1] : vector<2x10x8xf32> to vector<2x8xf32>
    %cst_11 = arith.constant dense<0xFF800000> : vector<2xf32>
    %8 = vector.multi_reduction <maximumf>, %7, %cst_11 [1] : vector<2x8xf32> to vector<2xf32>
    %9 = vector.shape_cast %8 : vector<2xf32> to vector<2x1xf32>
    %10 = vector.broadcast %9 : vector<2x1xf32> to vector<2x8xf32>
    %11 = arith.subf %7, %10 : vector<2x8xf32>
    %12 = math.exp %11 : vector<2x8xf32>
    %cst_12 = arith.constant dense<0.000000e+00> : vector<2xf32>
    %13 = vector.multi_reduction <add>, %12, %cst_12 [1] : vector<2x8xf32> to vector<2xf32>
    %14 = vector.shape_cast %13 : vector<2xf32> to vector<2x1xf32>
    %15 = vector.broadcast %14 : vector<2x1xf32> to vector<2x8xf32>
    %16 = arith.divf %12, %15 : vector<2x8xf32>
    %17 = vector.extract_strided_slice %0 {offsets = [0, 0, 0], sizes = [2, 1, 8], strides = [1, 1, 1]} : vector<2x10x8xf32> to vector<2x1x8xf32>
    %18 = vector.shape_cast %17 : vector<2x1x8xf32> to vector<2x8xf32>
    %19 = arith.mulf %16, %18 : vector<2x8xf32>
    %20 = vector.extract_strided_slice %0 {offsets = [0, 1, 0], sizes = [2, 1, 8], strides = [1, 1, 1]} : vector<2x10x8xf32> to vector<2x1x8xf32>
    %21 = vector.shape_cast %20 : vector<2x1x8xf32> to vector<2x8xf32>
    %22 = arith.mulf %16, %21 : vector<2x8xf32>
    %23 = vector.extract_strided_slice %0 {offsets = [0, 2, 0], sizes = [2, 1, 8], strides = [1, 1, 1]} : vector<2x10x8xf32> to vector<2x1x8xf32>
    %24 = vector.shape_cast %23 : vector<2x1x8xf32> to vector<2x8xf32>
    %25 = arith.mulf %16, %24 : vector<2x8xf32>
    %26 = vector.extract_strided_slice %0 {offsets = [0, 3, 0], sizes = [2, 1, 8], strides = [1, 1, 1]} : vector<2x10x8xf32> to vector<2x1x8xf32>
    %27 = vector.shape_cast %26 : vector<2x1x8xf32> to vector<2x8xf32>
    %28 = arith.mulf %16, %27 : vector<2x8xf32>
    %29 = vector.extract_strided_slice %0 {offsets = [0, 4, 0], sizes = [2, 1, 8], strides = [1, 1, 1]} : vector<2x10x8xf32> to vector<2x1x8xf32>
    %30 = vector.shape_cast %29 : vector<2x1x8xf32> to vector<2x8xf32>
    %31 = arith.mulf %16, %30 : vector<2x8xf32>
    %32 = vector.extract_strided_slice %0 {offsets = [0, 5, 0], sizes = [2, 1, 8], strides = [1, 1, 1]} : vector<2x10x8xf32> to vector<2x1x8xf32>
    %33 = vector.shape_cast %32 : vector<2x1x8xf32> to vector<2x8xf32>
    %34 = arith.mulf %16, %33 : vector<2x8xf32>
    %35 = vector.extract_strided_slice %0 {offsets = [0, 6, 0], sizes = [2, 1, 8], strides = [1, 1, 1]} : vector<2x10x8xf32> to vector<2x1x8xf32>
    %36 = vector.shape_cast %35 : vector<2x1x8xf32> to vector<2x8xf32>
    %37 = arith.mulf %16, %36 : vector<2x8xf32>
    %38 = vector.extract_strided_slice %0 {offsets = [0, 7, 0], sizes = [2, 1, 8], strides = [1, 1, 1]} : vector<2x10x8xf32> to vector<2x1x8xf32>
    %39 = vector.shape_cast %38 : vector<2x1x8xf32> to vector<2x8xf32>
    %40 = arith.mulf %16, %39 : vector<2x8xf32>
    %cst_13 = arith.constant dense<0.000000e+00> : vector<2x128xf32>
    %41 = tpu.matmul %19, %2, %cst_13 {dimension_numbers = #tpu.dot_dimension_numbers<[1], [0], [0], [1], [0, 0, 1, 1], [], []>} : vector<2x8xf32>, vector<8x128xf32>, vector<2x128xf32> -> vector<2x128xf32>
    %42 = vector.broadcast %4 : vector<1x128xf32> to vector<2x128xf32>
    %43 = arith.addf %41, %42 : vector<2x128xf32>
    %cst_14 = arith.constant dense<0.000000e+00> : vector<2x128xf32>
    %44 = tpu.matmul %22, %2, %cst_14 {dimension_numbers = #tpu.dot_dimension_numbers<[1], [0], [0], [1], [0, 0, 1, 1], [], []>} : vector<2x8xf32>, vector<8x128xf32>, vector<2x128xf32> -> vector<2x128xf32>
    %45 = vector.broadcast %4 : vector<1x128xf32> to vector<2x128xf32>
    %46 = arith.addf %44, %45 : vector<2x128xf32>
    %cst_15 = arith.constant dense<0.000000e+00> : vector<2x128xf32>
    %47 = tpu.matmul %25, %2, %cst_15 {dimension_numbers = #tpu.dot_dimension_numbers<[1], [0], [0], [1], [0, 0, 1, 1], [], []>} : vector<2x8xf32>, vector<8x128xf32>, vector<2x128xf32> -> vector<2x128xf32>
    %48 = vector.broadcast %4 : vector<1x128xf32> to vector<2x128xf32>
    %49 = arith.addf %47, %48 : vector<2x128xf32>
    %cst_16 = arith.constant dense<0.000000e+00> : vector<2x128xf32>
    %50 = tpu.matmul %28, %2, %cst_16 {dimension_numbers = #tpu.dot_dimension_numbers<[1], [0], [0], [1], [0, 0, 1, 1], [], []>} : vector<2x8xf32>, vector<8x128xf32>, vector<2x128xf32> -> vector<2x128xf32>
    %51 = vector.broadcast %4 : vector<1x128xf32> to vector<2x128xf32>
    %52 = arith.addf %50, %51 : vector<2x128xf32>
    %cst_17 = arith.constant dense<0.000000e+00> : vector<2x128xf32>
    %53 = tpu.matmul %31, %2, %cst_17 {dimension_numbers = #tpu.dot_dimension_numbers<[1], [0], [0], [1], [0, 0, 1, 1], [], []>} : vector<2x8xf32>, vector<8x128xf32>, vector<2x128xf32> -> vector<2x128xf32>
    %54 = vector.broadcast %4 : vector<1x128xf32> to vector<2x128xf32>
    %55 = arith.addf %53, %54 : vector<2x128xf32>
    %cst_18 = arith.constant dense<0.000000e+00> : vector<2x128xf32>
    %56 = tpu.matmul %34, %2, %cst_18 {dimension_numbers = #tpu.dot_dimension_numbers<[1], [0], [0], [1], [0, 0, 1, 1], [], []>} : vector<2x8xf32>, vector<8x128xf32>, vector<2x128xf32> -> vector<2x128xf32>
    %57 = vector.broadcast %4 : vector<1x128xf32> to vector<2x128xf32>
    %58 = arith.addf %56, %57 : vector<2x128xf32>
    %cst_19 = arith.constant dense<0.000000e+00> : vector<2x128xf32>
    %59 = tpu.matmul %37, %2, %cst_19 {dimension_numbers = #tpu.dot_dimension_numbers<[1], [0], [0], [1], [0, 0, 1, 1], [], []>} : vector<2x8xf32>, vector<8x128xf32>, vector<2x128xf32> -> vector<2x128xf32>
    %60 = vector.broadcast %4 : vector<1x128xf32> to vector<2x128xf32>
    %61 = arith.addf %59, %60 : vector<2x128xf32>
    %cst_20 = arith.constant dense<0.000000e+00> : vector<2x128xf32>
    %62 = tpu.matmul %40, %2, %cst_20 {dimension_numbers = #tpu.dot_dimension_numbers<[1], [0], [0], [1], [0, 0, 1, 1], [], []>} : vector<2x8xf32>, vector<8x128xf32>, vector<2x128xf32> -> vector<2x128xf32>
    %63 = vector.broadcast %4 : vector<1x128xf32> to vector<2x128xf32>
    %64 = arith.addf %62, %63 : vector<2x128xf32>
    %cst_21 = arith.constant 0.000000e+00 : f32
    %65 = vector.broadcast %cst_21 : f32 to vector<2x32xf32>
    %cst_22 = arith.constant 0.000000e+00 : f32
    %66 = vector.broadcast %cst_22 : f32 to vector<2x32xf32>
    %cst_23 = arith.constant dense<0.000000e+00> : vector<2x128xf32>
    %67 = tpu.matmul %65, %3, %cst_23 {dimension_numbers = #tpu.dot_dimension_numbers<[1], [0], [0], [1], [0, 0, 1, 1], [], []>} : vector<2x32xf32>, vector<32x128xf32>, vector<2x128xf32> -> vector<2x128xf32>
    %68 = arith.addf %43, %67 : vector<2x128xf32>
    %69 = arith.negf %68 : vector<2x128xf32>
    %70 = math.exp %69 : vector<2x128xf32>
    %cst_24 = arith.constant 1.000000e+00 : f32
    %71 = vector.broadcast %cst_24 : f32 to vector<2x128xf32>
    %72 = arith.addf %71, %70 : vector<2x128xf32>
    %73 = arith.divf %71, %72 : vector<2x128xf32>
    %74 = math.tanh %68 : vector<2x128xf32>
    %75 = vector.extract_strided_slice %73 {offsets = [0, 0], sizes = [2, 32], strides = [1, 1]} : vector<2x128xf32> to vector<2x32xf32>
    %76 = vector.extract_strided_slice %73 {offsets = [0, 32], sizes = [2, 32], strides = [1, 1]} : vector<2x128xf32> to vector<2x32xf32>
    %77 = vector.extract_strided_slice %74 {offsets = [0, 64], sizes = [2, 32], strides = [1, 1]} : vector<2x128xf32> to vector<2x32xf32>
    %78 = vector.extract_strided_slice %73 {offsets = [0, 96], sizes = [2, 32], strides = [1, 1]} : vector<2x128xf32> to vector<2x32xf32>
    %79 = arith.mulf %76, %66 : vector<2x32xf32>
    %80 = arith.mulf %75, %77 : vector<2x32xf32>
    %81 = arith.addf %79, %80 : vector<2x32xf32>
    %82 = math.tanh %81 : vector<2x32xf32>
    %83 = arith.mulf %78, %82 : vector<2x32xf32>
    %cst_25 = arith.constant dense<0.000000e+00> : vector<2x128xf32>
    %84 = tpu.matmul %83, %3, %cst_25 {dimension_numbers = #tpu.dot_dimension_numbers<[1], [0], [0], [1], [0, 0, 1, 1], [], []>} : vector<2x32xf32>, vector<32x128xf32>, vector<2x128xf32> -> vector<2x128xf32>
    %85 = arith.addf %46, %84 : vector<2x128xf32>
    %86 = arith.negf %85 : vector<2x128xf32>
    %87 = math.exp %86 : vector<2x128xf32>
    %cst_26 = arith.constant 1.000000e+00 : f32
    %88 = vector.broadcast %cst_26 : f32 to vector<2x128xf32>
    %89 = arith.addf %88, %87 : vector<2x128xf32>
    %90 = arith.divf %88, %89 : vector<2x128xf32>
    %91 = math.tanh %85 : vector<2x128xf32>
    %92 = vector.extract_strided_slice %90 {offsets = [0, 0], sizes = [2, 32], strides = [1, 1]} : vector<2x128xf32> to vector<2x32xf32>
    %93 = vector.extract_strided_slice %90 {offsets = [0, 32], sizes = [2, 32], strides = [1, 1]} : vector<2x128xf32> to vector<2x32xf32>
    %94 = vector.extract_strided_slice %91 {offsets = [0, 64], sizes = [2, 32], strides = [1, 1]} : vector<2x128xf32> to vector<2x32xf32>
    %95 = vector.extract_strided_slice %90 {offsets = [0, 96], sizes = [2, 32], strides = [1, 1]} : vector<2x128xf32> to vector<2x32xf32>
    %96 = arith.mulf %93, %81 : vector<2x32xf32>
    %97 = arith.mulf %92, %94 : vector<2x32xf32>
    %98 = arith.addf %96, %97 : vector<2x32xf32>
    %99 = math.tanh %98 : vector<2x32xf32>
    %100 = arith.mulf %95, %99 : vector<2x32xf32>
    %cst_27 = arith.constant dense<0.000000e+00> : vector<2x128xf32>
    %101 = tpu.matmul %100, %3, %cst_27 {dimension_numbers = #tpu.dot_dimension_numbers<[1], [0], [0], [1], [0, 0, 1, 1], [], []>} : vector<2x32xf32>, vector<32x128xf32>, vector<2x128xf32> -> vector<2x128xf32>
    %102 = arith.addf %49, %101 : vector<2x128xf32>
    %103 = arith.negf %102 : vector<2x128xf32>
    %104 = math.exp %103 : vector<2x128xf32>
    %cst_28 = arith.constant 1.000000e+00 : f32
    %105 = vector.broadcast %cst_28 : f32 to vector<2x128xf32>
    %106 = arith.addf %105, %104 : vector<2x128xf32>
    %107 = arith.divf %105, %106 : vector<2x128xf32>
    %108 = math.tanh %102 : vector<2x128xf32>
    %109 = vector.extract_strided_slice %107 {offsets = [0, 0], sizes = [2, 32], strides = [1, 1]} : vector<2x128xf32> to vector<2x32xf32>
    %110 = vector.extract_strided_slice %107 {offsets = [0, 32], sizes = [2, 32], strides = [1, 1]} : vector<2x128xf32> to vector<2x32xf32>
    %111 = vector.extract_strided_slice %108 {offsets = [0, 64], sizes = [2, 32], strides = [1, 1]} : vector<2x128xf32> to vector<2x32xf32>
    %112 = vector.extract_strided_slice %107 {offsets = [0, 96], sizes = [2, 32], strides = [1, 1]} : vector<2x128xf32> to vector<2x32xf32>
    %113 = arith.mulf %110, %98 : vector<2x32xf32>
    %114 = arith.mulf %109, %111 : vector<2x32xf32>
    %115 = arith.addf %113, %114 : vector<2x32xf32>
    %116 = math.tanh %115 : vector<2x32xf32>
    %117 = arith.mulf %112, %116 : vector<2x32xf32>
    %cst_29 = arith.constant dense<0.000000e+00> : vector<2x128xf32>
    %118 = tpu.matmul %117, %3, %cst_29 {dimension_numbers = #tpu.dot_dimension_numbers<[1], [0], [0], [1], [0, 0, 1, 1], [], []>} : vector<2x32xf32>, vector<32x128xf32>, vector<2x128xf32> -> vector<2x128xf32>
    %119 = arith.addf %52, %118 : vector<2x128xf32>
    %120 = arith.negf %119 : vector<2x128xf32>
    %121 = math.exp %120 : vector<2x128xf32>
    %cst_30 = arith.constant 1.000000e+00 : f32
    %122 = vector.broadcast %cst_30 : f32 to vector<2x128xf32>
    %123 = arith.addf %122, %121 : vector<2x128xf32>
    %124 = arith.divf %122, %123 : vector<2x128xf32>
    %125 = math.tanh %119 : vector<2x128xf32>
    %126 = vector.extract_strided_slice %124 {offsets = [0, 0], sizes = [2, 32], strides = [1, 1]} : vector<2x128xf32> to vector<2x32xf32>
    %127 = vector.extract_strided_slice %124 {offsets = [0, 32], sizes = [2, 32], strides = [1, 1]} : vector<2x128xf32> to vector<2x32xf32>
    %128 = vector.extract_strided_slice %125 {offsets = [0, 64], sizes = [2, 32], strides = [1, 1]} : vector<2x128xf32> to vector<2x32xf32>
    %129 = vector.extract_strided_slice %124 {offsets = [0, 96], sizes = [2, 32], strides = [1, 1]} : vector<2x128xf32> to vector<2x32xf32>
    %130 = arith.mulf %127, %115 : vector<2x32xf32>
    %131 = arith.mulf %126, %128 : vector<2x32xf32>
    %132 = arith.addf %130, %131 : vector<2x32xf32>
    %133 = math.tanh %132 : vector<2x32xf32>
    %134 = arith.mulf %129, %133 : vector<2x32xf32>
    %cst_31 = arith.constant dense<0.000000e+00> : vector<2x128xf32>
    %135 = tpu.matmul %134, %3, %cst_31 {dimension_numbers = #tpu.dot_dimension_numbers<[1], [0], [0], [1], [0, 0, 1, 1], [], []>} : vector<2x32xf32>, vector<32x128xf32>, vector<2x128xf32> -> vector<2x128xf32>
    %136 = arith.addf %55, %135 : vector<2x128xf32>
    %137 = arith.negf %136 : vector<2x128xf32>
    %138 = math.exp %137 : vector<2x128xf32>
    %cst_32 = arith.constant 1.000000e+00 : f32
    %139 = vector.broadcast %cst_32 : f32 to vector<2x128xf32>
    %140 = arith.addf %139, %138 : vector<2x128xf32>
    %141 = arith.divf %139, %140 : vector<2x128xf32>
    %142 = math.tanh %136 : vector<2x128xf32>
    %143 = vector.extract_strided_slice %141 {offsets = [0, 0], sizes = [2, 32], strides = [1, 1]} : vector<2x128xf32> to vector<2x32xf32>
    %144 = vector.extract_strided_slice %141 {offsets = [0, 32], sizes = [2, 32], strides = [1, 1]} : vector<2x128xf32> to vector<2x32xf32>
    %145 = vector.extract_strided_slice %142 {offsets = [0, 64], sizes = [2, 32], strides = [1, 1]} : vector<2x128xf32> to vector<2x32xf32>
    %146 = vector.extract_strided_slice %141 {offsets = [0, 96], sizes = [2, 32], strides = [1, 1]} : vector<2x128xf32> to vector<2x32xf32>
    %147 = arith.mulf %144, %132 : vector<2x32xf32>
    %148 = arith.mulf %143, %145 : vector<2x32xf32>
    %149 = arith.addf %147, %148 : vector<2x32xf32>
    %150 = math.tanh %149 : vector<2x32xf32>
    %151 = arith.mulf %146, %150 : vector<2x32xf32>
    %cst_33 = arith.constant dense<0.000000e+00> : vector<2x128xf32>
    %152 = tpu.matmul %151, %3, %cst_33 {dimension_numbers = #tpu.dot_dimension_numbers<[1], [0], [0], [1], [0, 0, 1, 1], [], []>} : vector<2x32xf32>, vector<32x128xf32>, vector<2x128xf32> -> vector<2x128xf32>
    %153 = arith.addf %58, %152 : vector<2x128xf32>
    %154 = arith.negf %153 : vector<2x128xf32>
    %155 = math.exp %154 : vector<2x128xf32>
    %cst_34 = arith.constant 1.000000e+00 : f32
    %156 = vector.broadcast %cst_34 : f32 to vector<2x128xf32>
    %157 = arith.addf %156, %155 : vector<2x128xf32>
    %158 = arith.divf %156, %157 : vector<2x128xf32>
    %159 = math.tanh %153 : vector<2x128xf32>
    %160 = vector.extract_strided_slice %158 {offsets = [0, 0], sizes = [2, 32], strides = [1, 1]} : vector<2x128xf32> to vector<2x32xf32>
    %161 = vector.extract_strided_slice %158 {offsets = [0, 32], sizes = [2, 32], strides = [1, 1]} : vector<2x128xf32> to vector<2x32xf32>
    %162 = vector.extract_strided_slice %159 {offsets = [0, 64], sizes = [2, 32], strides = [1, 1]} : vector<2x128xf32> to vector<2x32xf32>
    %163 = vector.extract_strided_slice %158 {offsets = [0, 96], sizes = [2, 32], strides = [1, 1]} : vector<2x128xf32> to vector<2x32xf32>
    %164 = arith.mulf %161, %149 : vector<2x32xf32>
    %165 = arith.mulf %160, %162 : vector<2x32xf32>
    %166 = arith.addf %164, %165 : vector<2x32xf32>
    %167 = math.tanh %166 : vector<2x32xf32>
    %168 = arith.mulf %163, %167 : vector<2x32xf32>
    %cst_35 = arith.constant dense<0.000000e+00> : vector<2x128xf32>
    %169 = tpu.matmul %168, %3, %cst_35 {dimension_numbers = #tpu.dot_dimension_numbers<[1], [0], [0], [1], [0, 0, 1, 1], [], []>} : vector<2x32xf32>, vector<32x128xf32>, vector<2x128xf32> -> vector<2x128xf32>
    %170 = arith.addf %61, %169 : vector<2x128xf32>
    %171 = arith.negf %170 : vector<2x128xf32>
    %172 = math.exp %171 : vector<2x128xf32>
    %cst_36 = arith.constant 1.000000e+00 : f32
    %173 = vector.broadcast %cst_36 : f32 to vector<2x128xf32>
    %174 = arith.addf %173, %172 : vector<2x128xf32>
    %175 = arith.divf %173, %174 : vector<2x128xf32>
    %176 = math.tanh %170 : vector<2x128xf32>
    %177 = vector.extract_strided_slice %175 {offsets = [0, 0], sizes = [2, 32], strides = [1, 1]} : vector<2x128xf32> to vector<2x32xf32>
    %178 = vector.extract_strided_slice %175 {offsets = [0, 32], sizes = [2, 32], strides = [1, 1]} : vector<2x128xf32> to vector<2x32xf32>
    %179 = vector.extract_strided_slice %176 {offsets = [0, 64], sizes = [2, 32], strides = [1, 1]} : vector<2x128xf32> to vector<2x32xf32>
    %180 = vector.extract_strided_slice %175 {offsets = [0, 96], sizes = [2, 32], strides = [1, 1]} : vector<2x128xf32> to vector<2x32xf32>
    %181 = arith.mulf %178, %166 : vector<2x32xf32>
    %182 = arith.mulf %177, %179 : vector<2x32xf32>
    %183 = arith.addf %181, %182 : vector<2x32xf32>
    %184 = math.tanh %183 : vector<2x32xf32>
    %185 = arith.mulf %180, %184 : vector<2x32xf32>
    %cst_37 = arith.constant dense<0.000000e+00> : vector<2x128xf32>
    %186 = tpu.matmul %185, %3, %cst_37 {dimension_numbers = #tpu.dot_dimension_numbers<[1], [0], [0], [1], [0, 0, 1, 1], [], []>} : vector<2x32xf32>, vector<32x128xf32>, vector<2x128xf32> -> vector<2x128xf32>
    %187 = arith.addf %64, %186 : vector<2x128xf32>
    %188 = arith.negf %187 : vector<2x128xf32>
    %189 = math.exp %188 : vector<2x128xf32>
    %cst_38 = arith.constant 1.000000e+00 : f32
    %190 = vector.broadcast %cst_38 : f32 to vector<2x128xf32>
    %191 = arith.addf %190, %189 : vector<2x128xf32>
    %192 = arith.divf %190, %191 : vector<2x128xf32>
    %193 = math.tanh %187 : vector<2x128xf32>
    %194 = vector.extract_strided_slice %192 {offsets = [0, 0], sizes = [2, 32], strides = [1, 1]} : vector<2x128xf32> to vector<2x32xf32>
    %195 = vector.extract_strided_slice %192 {offsets = [0, 32], sizes = [2, 32], strides = [1, 1]} : vector<2x128xf32> to vector<2x32xf32>
    %196 = vector.extract_strided_slice %193 {offsets = [0, 64], sizes = [2, 32], strides = [1, 1]} : vector<2x128xf32> to vector<2x32xf32>
    %197 = vector.extract_strided_slice %192 {offsets = [0, 96], sizes = [2, 32], strides = [1, 1]} : vector<2x128xf32> to vector<2x32xf32>
    %198 = arith.mulf %195, %183 : vector<2x32xf32>
    %199 = arith.mulf %194, %196 : vector<2x32xf32>
    %200 = arith.addf %198, %199 : vector<2x32xf32>
    %201 = math.tanh %200 : vector<2x32xf32>
    %202 = arith.mulf %197, %201 : vector<2x32xf32>
    %203 = vector.extract_strided_slice %19 {offsets = [0, 0], sizes = [1, 8], strides = [1, 1]} : vector<2x8xf32> to vector<1x8xf32>
    %204 = vector.extract_strided_slice %22 {offsets = [0, 0], sizes = [1, 8], strides = [1, 1]} : vector<2x8xf32> to vector<1x8xf32>
    %205 = vector.extract_strided_slice %25 {offsets = [0, 0], sizes = [1, 8], strides = [1, 1]} : vector<2x8xf32> to vector<1x8xf32>
    %206 = vector.extract_strided_slice %28 {offsets = [0, 0], sizes = [1, 8], strides = [1, 1]} : vector<2x8xf32> to vector<1x8xf32>
    %207 = vector.extract_strided_slice %31 {offsets = [0, 0], sizes = [1, 8], strides = [1, 1]} : vector<2x8xf32> to vector<1x8xf32>
    %208 = vector.extract_strided_slice %34 {offsets = [0, 0], sizes = [1, 8], strides = [1, 1]} : vector<2x8xf32> to vector<1x8xf32>
    %209 = vector.extract_strided_slice %37 {offsets = [0, 0], sizes = [1, 8], strides = [1, 1]} : vector<2x8xf32> to vector<1x8xf32>
    %210 = vector.extract_strided_slice %40 {offsets = [0, 0], sizes = [1, 8], strides = [1, 1]} : vector<2x8xf32> to vector<1x8xf32>
    %211 = tpu.concatenate %203, %204, %205, %206, %207, %208, %209, %210 in 0 : vector<1x8xf32>, vector<1x8xf32>, vector<1x8xf32>, vector<1x8xf32>, vector<1x8xf32>, vector<1x8xf32>, vector<1x8xf32>, vector<1x8xf32> -> vector<8x8xf32>
    %212 = tpu.transpose %211, [1, 0] : vector<8x8xf32> -> vector<8x8xf32>
    %cst_39 = arith.constant 0.000000e+00 : f32
    %213 = vector.broadcast %cst_39 : f32 to vector<8x2xf32>
    %214 = tpu.concatenate %212, %213 in 1 : vector<8x8xf32>, vector<8x2xf32> -> vector<8x10xf32>
    %c0_40 = arith.constant 0 : index
    %c0_41 = arith.constant 0 : index
    %c0_42 = arith.constant 0 : index
    %215 = vector.load %arg5[%c0_40, %c0_41, %c0_42] : memref<2x8x10xf32, #tpu.memory_space<vmem>>, vector<1x8x10xf32>
    %216 = vector.shape_cast %215 : vector<1x8x10xf32> to vector<8x10xf32>
    %217 = vector.shape_cast %214 : vector<8x10xf32> to vector<1x8x10xf32>
    tpu.vector_store %arg5[%c0_40, %c0_41, %c0_42], %217 {strides = array<i32>} : memref<2x8x10xf32, #tpu.memory_space<vmem>>, vector<1x8x10xf32>,
    %218 = vector.extract_strided_slice %83 {offsets = [0, 0], sizes = [1, 32], strides = [1, 1]} : vector<2x32xf32> to vector<1x32xf32>
    %219 = vector.extract_strided_slice %100 {offsets = [0, 0], sizes = [1, 32], strides = [1, 1]} : vector<2x32xf32> to vector<1x32xf32>
    %220 = vector.extract_strided_slice %117 {offsets = [0, 0], sizes = [1, 32], strides = [1, 1]} : vector<2x32xf32> to vector<1x32xf32>
    %221 = vector.extract_strided_slice %134 {offsets = [0, 0], sizes = [1, 32], strides = [1, 1]} : vector<2x32xf32> to vector<1x32xf32>
    %222 = vector.extract_strided_slice %151 {offsets = [0, 0], sizes = [1, 32], strides = [1, 1]} : vector<2x32xf32> to vector<1x32xf32>
    %223 = vector.extract_strided_slice %168 {offsets = [0, 0], sizes = [1, 32], strides = [1, 1]} : vector<2x32xf32> to vector<1x32xf32>
    %224 = vector.extract_strided_slice %185 {offsets = [0, 0], sizes = [1, 32], strides = [1, 1]} : vector<2x32xf32> to vector<1x32xf32>
    %225 = vector.extract_strided_slice %202 {offsets = [0, 0], sizes = [1, 32], strides = [1, 1]} : vector<2x32xf32> to vector<1x32xf32>
    %226 = tpu.concatenate %218, %219, %220, %221, %222, %223, %224, %225 in 0 : vector<1x32xf32>, vector<1x32xf32>, vector<1x32xf32>, vector<1x32xf32>, vector<1x32xf32>, vector<1x32xf32>, vector<1x32xf32>, vector<1x32xf32> -> vector<8x32xf32>
    %c0_43 = arith.constant 0 : index
    %c0_44 = arith.constant 0 : index
    %c0_45 = arith.constant 0 : index
    %227 = vector.load %arg6[%c0_43, %c0_44, %c0_45] : memref<2x8x32xf32, #tpu.memory_space<vmem>>, vector<1x8x32xf32>
    %228 = vector.shape_cast %227 : vector<1x8x32xf32> to vector<8x32xf32>
    %229 = vector.shape_cast %226 : vector<8x32xf32> to vector<1x8x32xf32>
    tpu.vector_store %arg6[%c0_43, %c0_44, %c0_45], %229 {strides = array<i32>} : memref<2x8x32xf32, #tpu.memory_space<vmem>>, vector<1x8x32xf32>,
    %230 = vector.extract_strided_slice %19 {offsets = [1, 0], sizes = [1, 8], strides = [1, 1]} : vector<2x8xf32> to vector<1x8xf32>
    %231 = vector.extract_strided_slice %22 {offsets = [1, 0], sizes = [1, 8], strides = [1, 1]} : vector<2x8xf32> to vector<1x8xf32>
    %232 = vector.extract_strided_slice %25 {offsets = [1, 0], sizes = [1, 8], strides = [1, 1]} : vector<2x8xf32> to vector<1x8xf32>
    %233 = vector.extract_strided_slice %28 {offsets = [1, 0], sizes = [1, 8], strides = [1, 1]} : vector<2x8xf32> to vector<1x8xf32>
    %234 = vector.extract_strided_slice %31 {offsets = [1, 0], sizes = [1, 8], strides = [1, 1]} : vector<2x8xf32> to vector<1x8xf32>
    %235 = vector.extract_strided_slice %34 {offsets = [1, 0], sizes = [1, 8], strides = [1, 1]} : vector<2x8xf32> to vector<1x8xf32>
    %236 = vector.extract_strided_slice %37 {offsets = [1, 0], sizes = [1, 8], strides = [1, 1]} : vector<2x8xf32> to vector<1x8xf32>
    %237 = vector.extract_strided_slice %40 {offsets = [1, 0], sizes = [1, 8], strides = [1, 1]} : vector<2x8xf32> to vector<1x8xf32>
    %238 = tpu.concatenate %230, %231, %232, %233, %234, %235, %236, %237 in 0 : vector<1x8xf32>, vector<1x8xf32>, vector<1x8xf32>, vector<1x8xf32>, vector<1x8xf32>, vector<1x8xf32>, vector<1x8xf32>, vector<1x8xf32> -> vector<8x8xf32>
    %239 = tpu.transpose %238, [1, 0] : vector<8x8xf32> -> vector<8x8xf32>
    %cst_46 = arith.constant 0.000000e+00 : f32
    %240 = vector.broadcast %cst_46 : f32 to vector<8x2xf32>
    %241 = tpu.concatenate %239, %240 in 1 : vector<8x8xf32>, vector<8x2xf32> -> vector<8x10xf32>
    %c1 = arith.constant 1 : index
    %c0_47 = arith.constant 0 : index
    %c0_48 = arith.constant 0 : index
    %242 = vector.load %arg5[%c1, %c0_47, %c0_48] : memref<2x8x10xf32, #tpu.memory_space<vmem>>, vector<1x8x10xf32>
    %243 = vector.shape_cast %242 : vector<1x8x10xf32> to vector<8x10xf32>
    %244 = vector.shape_cast %241 : vector<8x10xf32> to vector<1x8x10xf32>
    tpu.vector_store %arg5[%c1, %c0_47, %c0_48], %244 {strides = array<i32>} : memref<2x8x10xf32, #tpu.memory_space<vmem>>, vector<1x8x10xf32>,
    %245 = vector.extract_strided_slice %83 {offsets = [1, 0], sizes = [1, 32], strides = [1, 1]} : vector<2x32xf32> to vector<1x32xf32>
    %246 = vector.extract_strided_slice %100 {offsets = [1, 0], sizes = [1, 32], strides = [1, 1]} : vector<2x32xf32> to vector<1x32xf32>
    %247 = vector.extract_strided_slice %117 {offsets = [1, 0], sizes = [1, 32], strides = [1, 1]} : vector<2x32xf32> to vector<1x32xf32>
    %248 = vector.extract_strided_slice %134 {offsets = [1, 0], sizes = [1, 32], strides = [1, 1]} : vector<2x32xf32> to vector<1x32xf32>
    %249 = vector.extract_strided_slice %151 {offsets = [1, 0], sizes = [1, 32], strides = [1, 1]} : vector<2x32xf32> to vector<1x32xf32>
    %250 = vector.extract_strided_slice %168 {offsets = [1, 0], sizes = [1, 32], strides = [1, 1]} : vector<2x32xf32> to vector<1x32xf32>
    %251 = vector.extract_strided_slice %185 {offsets = [1, 0], sizes = [1, 32], strides = [1, 1]} : vector<2x32xf32> to vector<1x32xf32>
    %252 = vector.extract_strided_slice %202 {offsets = [1, 0], sizes = [1, 32], strides = [1, 1]} : vector<2x32xf32> to vector<1x32xf32>
    %253 = tpu.concatenate %245, %246, %247, %248, %249, %250, %251, %252 in 0 : vector<1x32xf32>, vector<1x32xf32>, vector<1x32xf32>, vector<1x32xf32>, vector<1x32xf32>, vector<1x32xf32>, vector<1x32xf32>, vector<1x32xf32> -> vector<8x32xf32>
    %c1_49 = arith.constant 1 : index
    %c0_50 = arith.constant 0 : index
    %c0_51 = arith.constant 0 : index
    %254 = vector.load %arg6[%c1_49, %c0_50, %c0_51] : memref<2x8x32xf32, #tpu.memory_space<vmem>>, vector<1x8x32xf32>
    %255 = vector.shape_cast %254 : vector<1x8x32xf32> to vector<8x32xf32>
    %256 = vector.shape_cast %253 : vector<8x32xf32> to vector<1x8x32xf32>
    tpu.vector_store %arg6[%c1_49, %c0_50, %c0_51], %256 {strides = array<i32>} : memref<2x8x32xf32, #tpu.memory_space<vmem>>, vector<1x8x32xf32>,
    return
  }
}

</mosaic_0001>

<bundles_post_ra>
// kernel: encoder_forward.1
= control target key start
LH: loop header
LB: loop body
LE: loop exit
PB: predicated region body
PF: predicated region fallthrough
CT: control target
= control target key end

     0   :  { %12 = vsyncpa [#allocation3], 0  ;;  %v2178_v1 = vmov 0   ;;  %s2523_s0 = inlined_call_operand.vmem [shape: f32[2,10,8], index: 0, kind: input, shape index: {}]   ;;  %s2524_s1 = inlined_call_operand.vmem [shape: f32[1,10,1], index: 1, kind: input, shape index: {}]   ;;  %s2525_s2 = inlined_call_operand.vmem [shape: f32[8,128], index: 2, kind: input, shape index: {}]   ;;  %s2526_s3 = inlined_call_operand.vmem [shape: f32[32,128], index: 3, kind: input, shape index: {}]   ;;  %s2527_s4 = inlined_call_operand.vmem [shape: f32[1,128], index: 4, kind: input, shape index: {}]   ;;  %s2528_s5 = inlined_call_operand.hbm [shape: f32[2,8,10], index: 5, kind: output, shape index: {0}]   ;;  %s2529_s6 = inlined_call_operand.hbm [shape: f32[2,8,32], index: 6, kind: output, shape index: {1}]  }
   0x1   :  { %v28_v0 = vld [vmem:[%s2524_s1] sm:$0xff]  ;;  %2057 = vset.pattern.permute.xlu0 %v2178_v1 }
   0x2   :  { %13 = vsyncpa [#allocation5], 0  ;;  %38 = vperm.xlu0 %2057, %v28_v0   ;;  %v29_v2 = vld [vmem:[%s2524_s1 + $0x8] sm:$0x3]  ;;  %v2232_v4 = vld [vmem:[%s2523_s0] sm:$0xff]  ;;  %vm50_vm0 = vcmask 64512  }
   0x3   :  { %v2237_v5 = vld [vmem:[%s2523_s0 + $0x10] sm:$0xff]  ;;  %v25_v6 = vld [vmem:[%s2523_s0 + $0x8] sm:$0x3]  ;;  %v27_v7 = vld [vmem:[%s2523_s0 + $0x18] sm:$0x3]  ;;  %vm52_vm1 = vcmask 58368  }
   0x4   :  { %vm72_vm2 = vcmask 1041409   ;;  %v2258_v44 = vld [vmem:[%s2525_s2] sm:$0xff]  ;;  %v2179_v45 = vmov 0.0   ;;  %vm2180_vm3 = vmmov 0   ;;  %v108_v48 = vrot.slane %v2232_v4, 1  ;;  %s2182_s17 = smov 64  }
   0x5   :  { %1847 = vmatprep.subr.mxu0 %v2179_v45  ;;  %1852 = vmatprep.subr.mxu1 %v2179_v45  ;;  %v114_v49 = vrot.slane %v2232_v4, 2  ;;  %v109_v51 = vrot.slane %v2237_v5, 1  ;;  %v115_v52 = vrot.slane %v2237_v5, 2  ;;  %v120_v53 = vrot.slane %v2232_v4, 3  ;;  %s2183_s18 = smov 32  }
   0x6   :  { %43 = vperm.xlu0 %2057, %v29_v2   ;;  %1848 = vmatpush3.msra.mxu0 %v2258_v44  ;;  %v126_v54 = vrot.slane %v2232_v4, 4  ;;  %v121_v56 = vrot.slane %v2237_v5, 3  ;;  %v127_v57 = vrot.slane %v2237_v5, 4  ;;  %v132_v58 = vrot.slane %v2232_v4, 5 }
   0x7   :  { %1849 = vmatprep.mubr.msk.f32.mxu0 %vm2180_vm3, %v2179_v45  ;;  %1853 = vmatpush3.msra.mxu1 %v2258_v44  ;;  %v133_v60 = vrot.slane %v2237_v5, 5  ;;  %v138_v61 = vrot.slane %v2232_v4, 6  ;;  %v139_v62 = vrot.slane %v2237_v5, 6  ;;  %v144_v63 = vrot.slane %v2232_v4, 7 }
   0x8   :  { %1854 = vmatprep.mubr.msk.f32.mxu1 %vm2180_vm3, %v2179_v45  ;;  %1857 = vmatprep.subr.mxu0 %v2179_v45  ;;  %v145_v2 = vrot.slane %v2237_v5, 7  ;;  %vm1577_vm4 = vcmask 1040384   ;;  %vm1579_vm5 = vcmask 1041408   ;;  %vm1581_vm6 = vcmask 1042432  }
   0x9   :  { %1862 = vmatprep.subr.mxu1 %v2179_v45  ;;  %vm1583_vm7 = vcmask 1043456   ;;  %vm1585_vm8 = vcmask 1044480   ;;  %vm1587_vm9 = vcmask 1045504   ;;  %vm1589_vm10 = vcmask 1046528  }
   0xa   :  { %vm764_vm11 = vcmask 261120   ;;  %vm1624_vm12 = vcmask 80896  }
  0x81   :  { %v39_v3 = vpop.permute.xlu0 %38 }
  0x82   :  { %v46_v8 = vmul.f32 %v39_v3, %v2232_v4  ;;  %v48_v9 = vmul.f32 %v39_v3, %v2237_v5 }
  0x84   :  { %v51_v13 = vsel %vm50_vm0, %v46_v8, 0.0  ;;  %v61_v14 = vsel %vm50_vm0, %v48_v9, 0.0 }
  0x85   :  { %v44_v10 = vpop.permute.xlu0 %43 }
  0x86   :  { %v47_v11 = vmul.f32 %v44_v10, %v25_v6  ;;  %v49_v12 = vmul.f32 %v44_v10, %v27_v7 }
  0x88   :  { %v53_v15 = vsel %vm52_vm1, %v47_v11, 0.0  ;;  %v62_v16 = vsel %vm52_vm1, %v49_v12, 0.0 }
  0x89   :  { %v54_v17 = vadd.f32 %v53_v15, %v51_v13  ;;  %v63_v18 = vadd.f32 %v62_v16, %v61_v14 }
  0x8b   :  { %v55_v19 = vrot.slane %v54_v17, 4  ;;  %v64_v20 = vrot.slane %v63_v18, 4 }
  0x8d   :  { %v56_v21 = vadd.f32 %v55_v19, %v54_v17  ;;  %v65_v22 = vadd.f32 %v64_v20, %v63_v18 }
  0x8f   :  { %v57_v23 = vrot.slane %v56_v21, 2  ;;  %v66_v24 = vrot.slane %v65_v22, 2 }
  0x91   :  { %v58_v25 = vadd.f32 %v57_v23, %v56_v21  ;;  %v67_v26 = vadd.f32 %v66_v24, %v65_v22 }
  0x93   :  { %v59_v27 = vrot.slane %v58_v25, 1  ;;  %v68_v28 = vrot.slane %v67_v26, 1 }
  0x95   :  { %v60_v29 = vadd.f32 %v59_v27, %v58_v25  ;;  %v69_v30 = vadd.f32 %v68_v28, %v67_v26 }
  0x97   :  { %v73_v31 = vsel %vm72_vm2, %v69_v30, %v60_v29 }
  0x98   :  { %v75_v32 = vsel %vm52_vm1, %v73_v31, -inf }
  0x99   :  { %76 = vmax.xlane.f32.xlu1 %v75_v32 }
 0x126   :  { %v77_v33 = vpop.xlane.xlu1 %76 }
 0x127   :  { %v79_v34 = vrot.slane %v77_v33, 1  ;;  %v82_v35 = vsub.f32 %v60_v29, %v77_v33 }
 0x129   :  { %v83_v36 = vsub.f32 %v69_v30, %v79_v34  ;;  %v84_v37 = vmul.f32 1.442695, %v82_v35 }
 0x12b   :  { %v86_v38 = vmul.f32 1.442695, %v83_v36 }
 0x12d   :  { %2058 = vpow2.f32 %v86_v38 }
 0x12e   :  { %2060 = vpow2.f32 %v84_v37 }
 0x137   :  { %v2059_v39 = vpop.eup %2058 }
 0x138   :  { %v90_v40 = vrot.slane %v2059_v39, 7  ;;  %v2061_v41 = vpop.eup %2060 }
 0x13a   :  { %v91_v42 = vsel %vm72_vm2, %v90_v40, %v2061_v41 }
 0x13b   :  { %v93_v43 = vsel %vm52_vm1, %v91_v42, 0.0 }
 0x13c   :  { %94 = vadd.xlane.f32.xlu1 %v93_v43 }
 0x1c9   :  { %v95_v46 = vpop.xlane.xlu1 %94 }
 0x1ca   :  { %v97_v47 = vrot.slane %v95_v46, 1  ;;  %2062 = vrcp.f32 %v95_v46 }
 0x1cc   :  { %2064 = vrcp.f32 %v97_v47 }
 0x1d4   :  { %v2063_v50 = vpop.eup %2062 }
 0x1d5   :  { %v101_v55 = vmul.f32 %v2063_v50, %v2061_v41 }
 0x1d6   :  { %v2065_v59 = vpop.eup %2064 }
 0x1d7   :  { %v103_v0 = vmul.f32 %v2065_v59, %v2059_v39  ;;  %v112_v1 = vmul.f32 %v108_v48, %v101_v55  ;;  %v118_v3 = vmul.f32 %v114_v49, %v101_v55  ;;  %v104_v9 = vmul.f32 %v101_v55, %v2232_v4  ;;  %v31_v48 = vld [vmem:[%s2526_s3] sm:$0xff]  ;;  %v32_v49 = vld [vmem:[%s2526_s3 + $0x8] sm:$0xff] }
 0x1d8   :  { %v124_v10 = vmul.f32 %v120_v53, %v101_v55  ;;  %v130_v16 = vmul.f32 %v126_v54, %v101_v55  ;;  %v136_v23 = vmul.f32 %v132_v58, %v101_v55  ;;  %v2295_v25 = vmul.f32 %v138_v61, %v101_v55 }
 0x1d9   :  { %v105_v6 = vmul.f32 %v103_v0, %v2237_v5  ;;  %v113_v7 = vmul.f32 %v109_v51, %v103_v0  ;;  %v119_v8 = vmul.f32 %v115_v52, %v103_v0  ;;  %v125_v11 = vmul.f32 %v121_v56, %v103_v0 }
 0x1da   :  { %v2286_v12 = vmul.f32 %v127_v57, %v103_v0  ;;  %v1563_v15 = vrot.slane %v112_v1, 7  ;;  %v1565_v18 = vrot.slane %v118_v3, 6  ;;  %v137_v20 = vmul.f32 %v133_v60, %v103_v0 }
 0x1db   :  { %v158_v13 = vrot.slane %v105_v6, 7  ;;  %v234_v14 = vrot.slane %v113_v7, 7  ;;  %v310_v17 = vrot.slane %v119_v8, 7  ;;  %v386_v19 = vrot.slane %v125_v11, 7  ;;  %v2394_v7 = vld [vmem:[%s2527_s4] ss:$0 sm:$0xff] }
 0x1dc   :  { %v462_v22 = vrot.slane %v2286_v12, 7  ;;  %v2291_v4 = vmul.f32 %v139_v62, %v103_v0  ;;  %v538_v24 = vrot.slane %v137_v20, 7  ;;  %v1654_v26 = vrot.slane %v119_v8, 6  ;;  %s2184_s4 = smov [#allocation4]  }
 0x1dd   :  { %v159_v5 = vsel %vm72_vm2, %v158_v13, %v104_v9  ;;  %v235_v21 = vsel %vm72_vm2, %v234_v14, %v112_v1  ;;  %v1567_v27 = vrot.slane %v124_v10, 5  ;;  %v1578_v28 = vsel %vm1577_vm4, %v104_v9, %v1563_v15  ;;  %s1752_s19 = sshll.u32 %s2184_s4, 4  ;;  %s1753_s19 = int_to_ptr.vmem [resolvable:$true] %s1752_s19 }
 0x1de   :  { %1850 = vmatmul.mubr.msk.f32.vlgmr.msra.gmra.mrb[0].mxu0 %vm50_vm0, %v159_v5  ;;  %1855 = vmatmul.mubr.msk.f32.vlgmr.msra.gmra.mrb[0].mxu1 %vm50_vm0, %v235_v21  ;;  %v1666_v29 = vsel %vm1577_vm4, %v105_v6, %v234_v14  ;;  %v311_v30 = vsel %vm72_vm2, %v310_v17, %v118_v3  ;;  %v387_v31 = vsel %vm72_vm2, %v386_v19, %v124_v10  ;;  %v1569_v32 = vrot.slane %v130_v16, 4  ;;  %s2130_s20 = scalar_lea.vmem %s1753_s19, 256  ;;  %p2135_p1 = scmp.lt.s32.totalorder %s1753_s19, %s1753_s19 }
 0x1df   :  { %1858 = vmatpush3.msra.mxu0 %v2258_v44  ;;  %1859 = vmatprep.mubr.msk.f32.mxu0 %vm2180_vm3, %v2179_v45  ;;  %v148_v33 = vmul.f32 %v144_v63, %v101_v55  ;;  %v463_v34 = vsel %vm72_vm2, %v462_v22, %v130_v16  ;;  %v614_v35 = vrot.slane %v2291_v4, 7  ;;  %v149_v36 = vmul.f32 %v145_v2, %v103_v0  ;;  %v33_v63 = vld [vmem:[%s2526_s3 + $0x10] sm:$0xff]  ;;  %v34_v0 = vld [vmem:[%s2526_s3 + $0x18] sm:$0xff]  ;;  %p2131_p0 = scmp.ne.s32.totalorder %s1753_s19, %s2130_s20  ;;  %p2136_p2 = scmp.lt.s32.totalorder %s2130_s20, %s2130_s20 }
 0x1e0   :  { %1863 = vmatpush3.msra.mxu1 %v2258_v44  ;;  %1864 = vmatprep.mubr.msk.f32.mxu1 %vm2180_vm3, %v2179_v45  ;;  %v1580_v37 = vsel %vm1579_vm5, %v1578_v28, %v1565_v18  ;;  %v539_v38 = vsel %vm72_vm2, %v538_v24, %v136_v23  ;;  %v1571_v39 = vrot.slane %v136_v23, 3  ;;  %v1656_v41 = vrot.slane %v125_v11, 5 }
 0x1e1   :  { %1867 = vmatprep.subr.mxu0 %v2179_v45  ;;  %1872 = vmatprep.subr.mxu1 %v2179_v45  ;;  %v1582_v40 = vsel %vm1581_vm6, %v1580_v37, %v1567_v27  ;;  %v1573_v42 = vrot.slane %v2295_v25, 2  ;;  %v1658_v46 = vrot.slane %v2286_v12, 4  ;;  %v1667_v47 = vsel %vm1579_vm5, %v1666_v29, %v1654_v26  ;;  %p2137_p3 = por %p2136_p2, %p2135_p1 }
 0x1e2   :  { %1860 = vmatmul.mubr.msk.f32.vlgmr.msra.gmra.mrb[2].mxu0 %vm50_vm0, %v311_v30  ;;  %1865 = vmatmul.mubr.msk.f32.vlgmr.msra.gmra.mrb[2].mxu1 %vm50_vm0, %v387_v31  ;;  %v1584_v43 = vsel %vm1583_vm7, %v1582_v40, %v1569_v32  ;;  %v1575_v50 = vrot.slane %v148_v33, 1  ;;  %v1660_v52 = vrot.slane %v137_v20, 3  ;;  %v1668_v53 = vsel %vm1581_vm6, %v1667_v47, %v1656_v41 }
 0x1e3   :  { %1868 = vmatpush3.msra.mxu0 %v2258_v44  ;;  %1869 = vmatprep.mubr.msk.f32.mxu0 %vm2180_vm3, %v2179_v45  ;;  %v1586_v51 = vsel %vm1585_vm8, %v1584_v43, %v1571_v39  ;;  %v690_v54 = vrot.slane %v149_v36, 7  ;;  %v1662_v56 = vrot.slane %v2291_v4, 2  ;;  %v1669_v57 = vsel %vm1583_vm7, %v1668_v53, %v1658_v46  ;;  %p2138_p4 = pnand %p2137_p3, %p2131_p0 }
 0x1e4   :  { %1873 = vmatpush3.msra.mxu1 %v2258_v44  ;;  %1874 = vmatprep.mubr.msk.f32.mxu1 %vm2180_vm3, %v2179_v45  ;;  %v1588_v55 = vsel %vm1587_vm9, %v1586_v51, %v1573_v42  ;;  %v1664_v59 = vrot.slane %v149_v36, 1  ;;  %v1670_v60 = vsel %vm1585_vm8, %v1669_v57, %v1660_v52  ;;  %v2348_v61 = vpack.c.bf16 %v32_v49, %v31_v48 }
 0x1e5   :  { %1877 = vmatprep.subr.mxu0 %v2179_v45  ;;  %1882 = vmatprep.subr.mxu1 %v2179_v45  ;;  %v2342_v58 = vsel %vm1589_vm10, %v1588_v55, %v1575_v50  ;;  %v1671_v62 = vsel %vm1587_vm9, %v1670_v60, %v1662_v56  ;;  %v2181_v2 = vmov 0.0|0.0   ;;  %v691_v3 = vsel %vm72_vm2, %v690_v54, %v148_v33 }
 0x1e6   :  { %1870 = vmatmul.mubr.msk.f32.vlgmr.msra.gmra.mrb[4].mxu0 %vm50_vm0, %v463_v34  ;;  %1875 = vmatmul.mubr.msk.f32.vlgmr.msra.gmra.mrb[4].mxu1 %vm50_vm0, %v539_v38  ;;  %v2361_v1 = vsel %vm1589_vm10, %v1671_v62, %v1664_v59  ;;  %v2371_v6 = vpack.c.bf16 %v34_v0, %v33_v63 }
 0x1e7   :  { %1878 = vmatpush3.msra.mxu0 %v2258_v44  ;;  %1879 = vmatprep.mubr.msk.f32.mxu0 %vm2180_vm3, %v2179_v45 }
 0x1e8   :  { %1883 = vmatpush3.msra.mxu1 %v2258_v44  ;;  %1884 = vmatprep.mubr.msk.f32.mxu1 %vm2180_vm3, %v2179_v45  ;;  %v615_v44 = vsel %vm72_vm2, %v614_v35, %v2295_v25 }
 0x1e9   :  { %1975 = vmatprep.subr.bf16.mxu0 %v2181_v2  ;;  %1981 = vmatprep.subr.bf16.mxu1 %v2181_v2 }
 0x1ea   :  { %1880 = vmatmul.mubr.msk.f32.vlgmr.msra.gmra.mrb[6].mxu0 %vm50_vm0, %v615_v44  ;;  %1885 = vmatmul.mubr.msk.f32.vlgmr.msra.gmra.mrb[6].mxu1 %vm50_vm0, %v691_v3 }
 0x1eb   :  { %1977 = vmatpush3.bf16.msra.mxu0 %v2348_v61  ;;  %1895 = vmatprep.mubr.msk.f32.mxu0 %vm2180_vm3, %v2179_v45 }
 0x1ec   :  { %1978 = vmatprep.subr.bf16.mxu0 %v2181_v2  ;;  %1983 = vmatpush3.bf16.msra.mxu1 %v2348_v61 }
 0x1ed   :  { %1984 = vmatprep.subr.bf16.mxu1 %v2181_v2  ;;  %1906 = vmatprep.mubr.msk.f32.mxu1 %vm2180_vm3, %v2179_v45 }
 0x1ef   :  { %1980 = vmatpush3.bf16.msra.mxu0 %v2371_v6 }
 0x1f0   :  { %1986 = vmatpush3.bf16.msra.mxu1 %v2371_v6  ;;  %1987 = vmatprep.subr.bf16.mxu0 %v2181_v2 }
 0x1f1   :  { %1993 = vmatprep.subr.bf16.mxu1 %v2181_v2 }
 0x1f2   :  { %1896 = vmatmul.mubr.f32.vlgmr.msra.gmra.mrb[0].mxu0 %v2179_v45 }
 0x1f3   :  { %1989 = vmatpush3.bf16.msra.mxu0 %v2348_v61  ;;  %1917 = vmatprep.mubr.msk.f32.mxu0 %vm2180_vm3, %v2179_v45 }
 0x1f4   :  { %1990 = vmatprep.subr.bf16.mxu0 %v2181_v2 }
 0x1f7   :  { %1992 = vmatpush3.bf16.msra.mxu0 %v2371_v6 }
 0x1f8   :  { %1999 = vmatprep.subr.bf16.mxu0 %v2181_v2 }
 0x2c5   :  { %v834_v8 = vpop.f32.mrb[0].mxu0 }
 0x2c6   :  { %v2023_v9 = vadd.f32 %v2394_v7, %v834_v8  ;;  %v1897_v10 = vpop.f32.mrb[1].mxu0 }
 0x2c8   :  { %2066 = vtanh.f32 %v2023_v9  ;;  %v1776_v12 = vmul.f32 -1.442695, %v2023_v9 }
 0x2ca   :  { %2068 = vpow2.f32 %v1776_v12 }
 0x2d2   :  { %v2067_v11 = vpop.eup %2066 }
 0x2d3   :  { %848 = vrot.lane.b32.xlu0 %v2067_v11, %s2182_s17 }
 0x2d4   :  { %v2069_v13 = vpop.eup %2068 }
 0x2d5   :  { %v842_v14 = vadd.f32 1.0, %v2069_v13 }
 0x2d7   :  { %2070 = vrcp.f32 %v842_v14 }
 0x2e1   :  { %v2071_v15 = vpop.eup %2070 }
 0x2e2   :  { %v846_v18 = vmul.f32 0.0, %v2071_v15 }
 0x345   :  { %v849_v16 = vpop.permute.xlu0 %848 }
 0x346   :  { %v851_v17 = vmul.f32 %v2071_v15, %v849_v16 }
 0x348   :  { %853 = vrot.lane.b32.xlu1 %v851_v17, %s2183_s18 }
 0x3ba   :  { %v854_v19 = vpop.permute.xlu1 %853 }
 0x3bb   :  { %v856_v20 = vadd.f32 %v854_v19, %v846_v18 }
 0x3bd   :  { %2072 = vtanh.f32 %v856_v20 }
 0x3c7   :  { %v2073_v5 = vpop.eup %2072 }
 0x3c8   :  { %859 = vrot.lane.b32.xlu0 %v2073_v5, %s2182_s17 }
 0x43a   :  { %v860_v21 = vpop.permute.xlu0 %859 }
 0x43b   :  { %v2400_v22 = vmul.f32 %v2071_v15, %v860_v21 }
 0x43d   :  { %864 = vrot.lane.b32.xlu0 %v2400_v22, %s2183_s18  ;;  %v1708_v60 = vrot.slane %v2400_v22, 1 }
 0x4af   :  { %v865_v4 = vpop.permute.xlu0 %864 }
 0x4b0   :  { %1907 = vmatmul.mubr.msk.f32.vlgmr.msra.gmra.mrb[0].mxu1 %vm764_vm11, %v865_v4 }
 0x4b1   :  { %1995 = vmatpush3.bf16.msra.mxu1 %v2348_v61  ;;  %1928 = vmatprep.mubr.msk.f32.mxu1 %vm2180_vm3, %v2179_v45 }
 0x4b2   :  { %1996 = vmatprep.subr.bf16.mxu1 %v2181_v2 }
 0x4b5   :  { %1998 = vmatpush3.bf16.msra.mxu1 %v2371_v6 }
 0x4b6   :  { %2005 = vmatprep.subr.bf16.mxu1 %v2181_v2 }
 0x583   :  { %v934_v23 = vpop.f32.mrb[0].mxu1 }
 0x584   :  { %v2024_v24 = vadd.f32 %v2394_v7, %v934_v23  ;;  %v1908_v25 = vpop.f32.mrb[1].mxu1 }
 0x586   :  { %2074 = vtanh.f32 %v2024_v24  ;;  %v1778_v27 = vmul.f32 -1.442695, %v2024_v24 }
 0x588   :  { %2076 = vpow2.f32 %v1778_v27 }
 0x590   :  { %v2075_v26 = vpop.eup %2074 }
 0x591   :  { %948 = vrot.lane.b32.xlu0 %v2075_v26, %s2182_s17 }
 0x592   :  { %v2077_v28 = vpop.eup %2076 }
 0x593   :  { %v942_v29 = vadd.f32 1.0, %v2077_v28 }
 0x595   :  { %2078 = vrcp.f32 %v942_v29 }
 0x59f   :  { %v2079_v30 = vpop.eup %2078 }
 0x5a0   :  { %v946_v33 = vmul.f32 %v2079_v30, %v856_v20 }
 0x603   :  { %v949_v31 = vpop.permute.xlu0 %948 }
 0x604   :  { %v951_v32 = vmul.f32 %v2079_v30, %v949_v31 }
 0x606   :  { %953 = vrot.lane.b32.xlu0 %v951_v32, %s2183_s18 }
 0x678   :  { %v954_v34 = vpop.permute.xlu0 %953 }
 0x679   :  { %v956_v35 = vadd.f32 %v954_v34, %v946_v33 }
 0x67b   :  { %2080 = vtanh.f32 %v956_v35 }
 0x685   :  { %v2081_v36 = vpop.eup %2080 }
 0x686   :  { %959 = vrot.lane.b32.xlu1 %v2081_v36, %s2182_s17 }
 0x6f8   :  { %v960_v37 = vpop.permute.xlu1 %959 }
 0x6f9   :  { %v962_v38 = vmul.f32 %v2079_v30, %v960_v37 }
 0x6fb   :  { %964 = vrot.lane.b32.xlu0 %v962_v38, %s2183_s18  ;;  %v1626_v56 = vrot.slane %v962_v38, 7  ;;  %v1722_v44 = vsel %vm1577_vm4, %v1708_v60, %v962_v38 }
 0x6fd   :  { %v1641_v0 = vsel %vm1577_vm4, %v2400_v22, %v1626_v56 }
 0x76d   :  { %v965_v39 = vpop.permute.xlu0 %964 }
 0x76e   :  { %1918 = vmatmul.mubr.msk.f32.vlgmr.msra.gmra.mrb[2].mxu0 %vm764_vm11, %v965_v39 }
 0x76f   :  { %2001 = vmatpush3.bf16.msra.mxu0 %v2348_v61  ;;  %1939 = vmatprep.mubr.msk.f32.mxu0 %vm2180_vm3, %v2179_v45 }
 0x770   :  { %2002 = vmatprep.subr.bf16.mxu0 %v2181_v2 }
 0x773   :  { %2004 = vmatpush3.bf16.msra.mxu0 %v2371_v6 }
 0x774   :  { %2011 = vmatprep.subr.bf16.mxu0 %v2181_v2 }
 0x841   :  { %v1034_v40 = vpop.f32.mrb[2].mxu0 }
 0x842   :  { %v2025_v41 = vadd.f32 %v2394_v7, %v1034_v40  ;;  %v1919_v42 = vpop.f32.mrb[3].mxu0 }
 0x844   :  { %2082 = vtanh.f32 %v2025_v41  ;;  %v1780_v46 = vmul.f32 -1.442695, %v2025_v41 }
 0x846   :  { %2084 = vpow2.f32 %v1780_v46 }
 0x84e   :  { %v2083_v43 = vpop.eup %2082 }
 0x84f   :  { %1048 = vrot.lane.b32.xlu1 %v2083_v43, %s2182_s17 }
 0x850   :  { %v2085_v47 = vpop.eup %2084 }
 0x851   :  { %v1042_v48 = vadd.f32 1.0, %v2085_v47 }
 0x853   :  { %2086 = vrcp.f32 %v1042_v48 }
 0x85d   :  { %v2087_v49 = vpop.eup %2086 }
 0x85e   :  { %v1046_v52 = vmul.f32 %v2087_v49, %v956_v35 }
 0x8c1   :  { %v1049_v50 = vpop.permute.xlu1 %1048 }
 0x8c2   :  { %v1051_v51 = vmul.f32 %v2087_v49, %v1049_v50 }
 0x8c4   :  { %1053 = vrot.lane.b32.xlu0 %v1051_v51, %s2183_s18 }
 0x936   :  { %v1054_v53 = vpop.permute.xlu0 %1053 }
 0x937   :  { %v1056_v54 = vadd.f32 %v1054_v53, %v1046_v52 }
 0x939   :  { %2088 = vtanh.f32 %v1056_v54 }
 0x943   :  { %v2089_v55 = vpop.eup %2088 }
 0x944   :  { %1059 = vrot.lane.b32.xlu1 %v2089_v55, %s2182_s17 }
 0x9b6   :  { %v1060_v57 = vpop.permute.xlu1 %1059 }
 0x9b7   :  { %v1062_v59 = vmul.f32 %v2087_v49, %v1060_v57 }
 0x9b9   :  { %v1628_v62 = vrot.slane %v1062_v59, 6  ;;  %v1710_v63 = vrot.slane %v1062_v59, 7  ;;  %1064 = vrot.lane.b32.xlu0 %v1062_v59, %s2183_s18 }
 0x9bb   :  { %v1642_v3 = vsel %vm1579_vm5, %v1641_v0, %v1628_v62  ;;  %v1723_v8 = vsel %vm1579_vm5, %v1722_v44, %v1710_v63 }
 0xa2b   :  { %v1065_v9 = vpop.permute.xlu0 %1064 }
 0xa2c   :  { %1929 = vmatmul.mubr.msk.f32.vlgmr.msra.gmra.mrb[2].mxu1 %vm764_vm11, %v1065_v9 }
 0xa2d   :  { %2007 = vmatpush3.bf16.msra.mxu1 %v2348_v61  ;;  %1950 = vmatprep.mubr.msk.f32.mxu1 %vm2180_vm3, %v2179_v45 }
 0xa2e   :  { %2008 = vmatprep.subr.bf16.mxu1 %v2181_v2 }
 0xa31   :  { %2010 = vmatpush3.bf16.msra.mxu1 %v2371_v6 }
 0xa32   :  { %2017 = vmatprep.subr.bf16.mxu1 %v2181_v2 }
 0xaff   :  { %v1134_v10 = vpop.f32.mrb[2].mxu1 }
 0xb00   :  { %v2026_v11 = vadd.f32 %v2394_v7, %v1134_v10  ;;  %v1930_v12 = vpop.f32.mrb[3].mxu1 }
 0xb02   :  { %2090 = vtanh.f32 %v2026_v11  ;;  %v1782_v14 = vmul.f32 -1.442695, %v2026_v11 }
 0xb04   :  { %2092 = vpow2.f32 %v1782_v14 }
 0xb0c   :  { %v2091_v13 = vpop.eup %2090 }
 0xb0d   :  { %1148 = vrot.lane.b32.xlu1 %v2091_v13, %s2182_s17 }
 0xb0e   :  { %v2093_v15 = vpop.eup %2092 }
 0xb0f   :  { %v1142_v16 = vadd.f32 1.0, %v2093_v15 }
 0xb11   :  { %2094 = vrcp.f32 %v1142_v16 }
 0xb1b   :  { %v2095_v17 = vpop.eup %2094 }
 0xb1c   :  { %v1146_v20 = vmul.f32 %v2095_v17, %v1056_v54 }
 0xb7f   :  { %v1149_v18 = vpop.permute.xlu1 %1148 }
 0xb80   :  { %v1151_v19 = vmul.f32 %v2095_v17, %v1149_v18 }
 0xb82   :  { %1153 = vrot.lane.b32.xlu0 %v1151_v19, %s2183_s18 }
 0xbf4   :  { %v1154_v5 = vpop.permute.xlu0 %1153 }
 0xbf5   :  { %v1156_v21 = vadd.f32 %v1154_v5, %v1146_v20 }
 0xbf7   :  { %2096 = vtanh.f32 %v1156_v21 }
 0xc01   :  { %v2097_v22 = vpop.eup %2096 }
 0xc02   :  { %1159 = vrot.lane.b32.xlu1 %v2097_v22, %s2182_s17 }
 0xc74   :  { %v1160_v4 = vpop.permute.xlu1 %1159 }
 0xc75   :  { %v1162_v23 = vmul.f32 %v2095_v17, %v1160_v4 }
 0xc77   :  { %v1630_v24 = vrot.slane %v1162_v23, 5  ;;  %v1712_v25 = vrot.slane %v1162_v23, 6  ;;  %1164 = vrot.lane.b32.xlu0 %v1162_v23, %s2183_s18 }
 0xc79   :  { %v1643_v26 = vsel %vm1581_vm6, %v1642_v3, %v1630_v24  ;;  %v1724_v27 = vsel %vm1581_vm6, %v1723_v8, %v1712_v25 }
 0xce9   :  { %v1165_v28 = vpop.permute.xlu0 %1164 }
 0xcea   :  { %1940 = vmatmul.mubr.msk.f32.vlgmr.msra.gmra.mrb[4].mxu0 %vm764_vm11, %v1165_v28 }
 0xceb   :  { %2013 = vmatpush3.bf16.msra.mxu0 %v2348_v61  ;;  %1961 = vmatprep.mubr.msk.f32.mxu0 %vm2180_vm3, %v2179_v45 }
 0xcec   :  { %2014 = vmatprep.subr.bf16.mxu0 %v2181_v2 }
 0xcef   :  { %2016 = vmatpush3.bf16.msra.mxu0 %v2371_v6 }
 0xdbd   :  { %v1234_v29 = vpop.f32.mrb[4].mxu0 }
 0xdbe   :  { %v2027_v30 = vadd.f32 %v2394_v7, %v1234_v29  ;;  %v1941_v31 = vpop.f32.mrb[5].mxu0 }
 0xdc0   :  { %2098 = vtanh.f32 %v2027_v30  ;;  %v1784_v33 = vmul.f32 -1.442695, %v2027_v30 }
 0xdc2   :  { %2100 = vpow2.f32 %v1784_v33 }
 0xdca   :  { %v2099_v32 = vpop.eup %2098 }
 0xdcb   :  { %1248 = vrot.lane.b32.xlu1 %v2099_v32, %s2182_s17 }
 0xdcc   :  { %v2101_v34 = vpop.eup %2100 }
 0xdcd   :  { %v1242_v35 = vadd.f32 1.0, %v2101_v34 }
 0xdcf   :  { %2102 = vrcp.f32 %v1242_v35 }
 0xdd9   :  { %v2103_v36 = vpop.eup %2102 }
 0xdda   :  { %v1246_v39 = vmul.f32 %v2103_v36, %v1156_v21 }
 0xe3d   :  { %v1249_v37 = vpop.permute.xlu1 %1248 }
 0xe3e   :  { %v1251_v38 = vmul.f32 %v2103_v36, %v1249_v37 }
 0xe40   :  { %1253 = vrot.lane.b32.xlu0 %v1251_v38, %s2183_s18 }
 0xeb2   :  { %v1254_v40 = vpop.permute.xlu0 %1253 }
 0xeb3   :  { %v1256_v41 = vadd.f32 %v1254_v40, %v1246_v39 }
 0xeb5   :  { %2104 = vtanh.f32 %v1256_v41 }
 0xebf   :  { %v2105_v42 = vpop.eup %2104 }
 0xec0   :  { %1259 = vrot.lane.b32.xlu1 %v2105_v42, %s2182_s17 }
 0xf32   :  { %v1260_v43 = vpop.permute.xlu1 %1259 }
 0xf33   :  { %v1262_v46 = vmul.f32 %v2103_v36, %v1260_v43 }
 0xf35   :  { %v1632_v47 = vrot.slane %v1262_v46, 4  ;;  %v1714_v48 = vrot.slane %v1262_v46, 5  ;;  %1264 = vrot.lane.b32.xlu0 %v1262_v46, %s2183_s18 }
 0xf37   :  { %v1644_v49 = vsel %vm1583_vm7, %v1643_v26, %v1632_v47  ;;  %v1725_v50 = vsel %vm1583_vm7, %v1724_v27, %v1714_v48 }
 0xfa7   :  { %v1265_v51 = vpop.permute.xlu0 %1264 }
 0xfa8   :  { %1951 = vmatmul.mubr.msk.f32.vlgmr.msra.gmra.mrb[4].mxu1 %vm764_vm11, %v1265_v51 }
 0xfa9   :  { %2019 = vmatpush3.bf16.msra.mxu1 %v2348_v61  ;;  %1972 = vmatprep.mubr.msk.f32.mxu1 %vm2180_vm3, %v2179_v45 }
 0xfaa   :  { %2020 = vmatprep.subr.bf16.mxu1 %v2181_v2 }
 0xfad   :  { %2022 = vmatpush3.bf16.msra.mxu1 %v2371_v6 }
0x107b   :  { %v1334_v52 = vpop.f32.mrb[4].mxu1 }
0x107c   :  { %v2028_v53 = vadd.f32 %v2394_v7, %v1334_v52  ;;  %v1952_v54 = vpop.f32.mrb[5].mxu1 }
0x107e   :  { %2106 = vtanh.f32 %v2028_v53  ;;  %v1786_v56 = vmul.f32 -1.442695, %v2028_v53 }
0x1080   :  { %2108 = vpow2.f32 %v1786_v56 }
0x1088   :  { %v2107_v55 = vpop.eup %2106 }
0x1089   :  { %1348 = vrot.lane.b32.xlu1 %v2107_v55, %s2182_s17 }
0x108a   :  { %v2109_v57 = vpop.eup %2108 }
0x108b   :  { %v1342_v59 = vadd.f32 1.0, %v2109_v57 }
0x108d   :  { %2110 = vrcp.f32 %v1342_v59 }
0x1097   :  { %v2111_v61 = vpop.eup %2110 }
0x1098   :  { %v1346_v2 = vmul.f32 %v2111_v61, %v1256_v41 }
0x10fb   :  { %v1349_v60 = vpop.permute.xlu1 %1348 }
0x10fc   :  { %v1351_v45 = vmul.f32 %v2111_v61, %v1349_v60 }
0x10fe   :  { %1353 = vrot.lane.b32.xlu0 %v1351_v45, %s2183_s18 }
0x1170   :  { %v1354_v6 = vpop.permute.xlu0 %1353 }
0x1171   :  { %v1356_v62 = vadd.f32 %v1354_v6, %v1346_v2 }
0x1173   :  { %2112 = vtanh.f32 %v1356_v62 }
0x117d   :  { %v2113_v63 = vpop.eup %2112 }
0x117e   :  { %1359 = vrot.lane.b32.xlu1 %v2113_v63, %s2182_s17 }
0x11f0   :  { %v1360_v0 = vpop.permute.xlu1 %1359 }
0x11f1   :  { %v1362_v44 = vmul.f32 %v2111_v61, %v1360_v0 }
0x11f3   :  { %v1634_v3 = vrot.slane %v1362_v44, 3  ;;  %v1716_v8 = vrot.slane %v1362_v44, 4  ;;  %1364 = vrot.lane.b32.xlu0 %v1362_v44, %s2183_s18 }
0x11f5   :  { %v1645_v9 = vsel %vm1585_vm8, %v1644_v49, %v1634_v3  ;;  %v1726_v10 = vsel %vm1585_vm8, %v1725_v50, %v1716_v8 }
0x1265   :  { %v1365_v11 = vpop.permute.xlu0 %1364 }
0x1266   :  { %1962 = vmatmul.mubr.msk.f32.vlgmr.msra.gmra.mrb[6].mxu0 %vm764_vm11, %v1365_v11 }
0x1339   :  { %v1434_v12 = vpop.f32.mrb[6].mxu0 }
0x133a   :  { %v2029_v13 = vadd.f32 %v2394_v7, %v1434_v12  ;;  %v1963_v14 = vpop.f32.mrb[7].mxu0 }
0x133c   :  { %2114 = vtanh.f32 %v2029_v13  ;;  %v1788_v16 = vmul.f32 -1.442695, %v2029_v13 }
0x133e   :  { %2116 = vpow2.f32 %v1788_v16 }
0x1346   :  { %v2115_v15 = vpop.eup %2114 }
0x1347   :  { %1448 = vrot.lane.b32.xlu1 %v2115_v15, %s2182_s17 }
0x1348   :  { %v2117_v17 = vpop.eup %2116 }
0x1349   :  { %v1442_v18 = vadd.f32 1.0, %v2117_v17 }
0x134b   :  { %2118 = vrcp.f32 %v1442_v18 }
0x1355   :  { %v2119_v19 = vpop.eup %2118 }
0x1356   :  { %v1446_v21 = vmul.f32 %v2119_v19, %v1356_v62 }
0x13b9   :  { %v1449_v20 = vpop.permute.xlu1 %1448 }
0x13ba   :  { %v1451_v5 = vmul.f32 %v2119_v19, %v1449_v20 }
0x13bc   :  { %1453 = vrot.lane.b32.xlu0 %v1451_v5, %s2183_s18 }
0x142e   :  { %v1454_v22 = vpop.permute.xlu0 %1453 }
0x142f   :  { %v1456_v4 = vadd.f32 %v1454_v22, %v1446_v21 }
0x1431   :  { %2120 = vtanh.f32 %v1456_v4 }
0x143b   :  { %v2121_v23 = vpop.eup %2120 }
0x143c   :  { %1459 = vrot.lane.b32.xlu1 %v2121_v23, %s2182_s17 }
0x14ae   :  { %v1460_v24 = vpop.permute.xlu1 %1459 }
0x14af   :  { %v1462_v25 = vmul.f32 %v2119_v19, %v1460_v24 }
0x14b1   :  { %v1636_v26 = vrot.slane %v1462_v25, 2  ;;  %v1718_v27 = vrot.slane %v1462_v25, 3  ;;  %1464 = vrot.lane.b32.xlu0 %v1462_v25, %s2183_s18 }
0x14b3   :  { %v1646_v28 = vsel %vm1587_vm9, %v1645_v9, %v1636_v26  ;;  %v1727_v29 = vsel %vm1587_vm9, %v1726_v10, %v1718_v27 }
0x1523   :  { %v1465_v30 = vpop.permute.xlu0 %1464 }
0x1524   :  { %1973 = vmatmul.mubr.msk.f32.vlgmr.msra.gmra.mrb[6].mxu1 %vm764_vm11, %v1465_v30 }
0x15f7   :  { %v1534_v31 = vpop.f32.mrb[6].mxu1 }
0x15f8   :  { %v2030_v32 = vadd.f32 %v2394_v7, %v1534_v31  ;;  %v1974_v33 = vpop.f32.mrb[7].mxu1 }
0x15fa   :  { %2122 = vtanh.f32 %v2030_v32  ;;  %v1790_v35 = vmul.f32 -1.442695, %v2030_v32 }
0x15fc   :  { %2124 = vpow2.f32 %v1790_v35 }
0x1604   :  { %v2123_v34 = vpop.eup %2122 }
0x1605   :  { %1548 = vrot.lane.b32.xlu1 %v2123_v34, %s2182_s17 }
0x1606   :  { %v2125_v36 = vpop.eup %2124 }
0x1607   :  { %v1542_v37 = vadd.f32 1.0, %v2125_v36 }
0x1609   :  { %2126 = vrcp.f32 %v1542_v37 }
0x1613   :  { %v2127_v38 = vpop.eup %2126 }
0x1614   :  { %v1546_v41 = vmul.f32 %v2127_v38, %v1456_v4 }
0x1677   :  { %v1549_v39 = vpop.permute.xlu1 %1548 }
0x1678   :  { %v1551_v40 = vmul.f32 %v2127_v38, %v1549_v39 }
0x167a   :  { %1553 = vrot.lane.b32.xlu0 %v1551_v40, %s2183_s18 }
0x1698   :  { %1591 = vxpose.xlu0.b32.start.end [1/1] (short) (narrow) %v2342_v58, 8 }
0x16ec   :  { %v1554_v42 = vpop.permute.xlu0 %1553 }
0x16ed   :  { %v1556_v7 = vadd.f32 %v1554_v42, %v1546_v41 }
0x16ef   :  { %2128 = vtanh.f32 %v1556_v7 }
0x16f9   :  { %v2129_v43 = vpop.eup %2128 }
0x16fa   :  { %1559 = vrot.lane.b32.xlu1 %v2129_v43, %s2182_s17 }
0x1718   :  { %v1607_v46 = vpop.trf.xlu0 }
0x1719   :  { %v1623_v47 = vsel %vm50_vm0, %v1607_v46, 0.0 }
0x171a   :  { %1625 = vst.msk [vmem:[#allocation2] sm:$0xff] %vm1624_vm12, %v1623_v47 }
0x176c   :  { %v1560_v48 = vpop.permute.xlu1 %1559 }
0x176d   :  { %v1562_v49 = vmul.f32 %v2127_v38, %v1560_v48 }
0x176f   :  { %v1639_v50 = vrot.slane %v1562_v49, 1  ;;  %v1720_v51 = vrot.slane %v1562_v49, 2 }
0x1771   :  { %v1647_v52 = vsel %vm1589_vm10, %v1646_v28, %v1639_v50  ;;  %v1728_v58 = vsel %vm1589_vm10, %v1727_v29, %v1720_v51 }
0x1772   :  { %1649 = vrot.lane.b32.xlu1 %v1647_v52, %s2183_s18 }
0x1776   :  { %1730 = vrot.lane.b32.xlu1 %v1728_v58, %s2183_s18 }
0x179f   :  { %1673 = vxpose.xlu1.b32.start.end [1/1] (short) (narrow) %v2361_v1, 8 }
0x17e4   :  { %v1650_v53 = vpop.permute.xlu1 %1649 }
0x17e5   :  { %1652 = vst.msk [vmem:[#allocation4] sm:$0xff] %vm764_vm11, %v1650_v53 }
0x17e8   :  { %v1731_v54 = vpop.permute.xlu1 %1730 }
0x17e9   :  { %1734 = vst.msk [vmem:[#allocation4 + $0x8] sm:$0xff] %vm764_vm11, %v1731_v54 }
0x17ea   :  { %2141 = shalt.err (!%p2138_p4)
}
0x17eb   :  { %s2142_s23 = scalar_lea.hbm %s2529_s6, 256 }
0x17ec   :  { %p2143_p5 = scmp.ne.s32.totalorder %s2529_s6, %s2142_s23  ;;  %p2146_p6 = scmp.lt.u32.totalorder %s2142_s23, %s2529_s6 }
0x17ee   :  { %p2148_p7 = pnand %p2146_p6, %p2143_p5 }
0x17f0   :  { %2151 = shalt.err (!%p2148_p7)
}
0x17f1   :  { %s2185_s28 = smov 128   ;;  %s2186_s29 = smov 8  }
0x17f2   :  { %1758 = dma.vmem_to_hbm [thread:$0]  %s1753_s19, 256, %s2529_s6, [#allocation5], %s2185_s28, %s2185_s28, %s2186_s29  }
0x17f3   :  { %s2187_s8 = smov [#allocation2]  }
0x17f4   :  { %s1740_s0 = sshll.u32 %s2187_s8, 4  ;;  %s1741_s0 = int_to_ptr.vmem [resolvable:$true] %s1740_s0 }
0x17f5   :  { %s2152_s1 = scalar_lea.vmem %s1741_s0, 256  ;;  %p2157_p9 = scmp.lt.s32.totalorder %s1741_s0, %s1741_s0 }
0x17f6   :  { %p2153_p8 = scmp.ne.s32.totalorder %s1741_s0, %s2152_s1  ;;  %p2158_p10 = scmp.lt.s32.totalorder %s2152_s1, %s2152_s1 }
0x17f8   :  { %p2159_p11 = por %p2158_p10, %p2157_p9 }
0x17fa   :  { %p2160_p12 = pnand %p2159_p11, %p2153_p8 }
0x181f   :  { %v1689_v1 = vpop.trf.xlu1 }
0x1820   :  { %v1705_v55 = vsel %vm50_vm0, %v1689_v1, 0.0 }
0x1821   :  { %1707 = vst.msk [vmem:[#allocation2 + $0x8] sm:$0xff] %vm1624_vm12, %v1705_v55 }
0x1822   :  { %2163 = shalt.err (!%p2160_p12)
}
0x1823   :  { %s2164_s10 = scalar_lea.hbm %s2528_s5, 256 }
0x1824   :  { %p2165_p13 = scmp.ne.s32.totalorder %s2528_s5, %s2164_s10  ;;  %p2168_p0 = scmp.lt.u32.totalorder %s2164_s10, %s2528_s5 }
0x1826   :  { %p2170_p1 = pnand %p2168_p0, %p2165_p13 }
0x1828   :  { %2173 = shalt.err (!%p2170_p1)
}
0x1829   :  { %1746 = dma.vmem_to_hbm [thread:$0]  %s1741_s0, 256, %s2528_s5, [#allocation3], %s2185_s28, %s2185_s28, %s2186_s29  }
0x182a   :  { %2174 = dma.done.wait [#allocation3], 256  }
0x182b   :  { %2175 = vsyncadd [#allocation3], 4294967040 }
0x182c   :  { %2176 = dma.done.wait [#allocation5], 256  }
0x182d   :  { %2177 = vsyncadd [#allocation5], 4294967040 }
0x182e   :  { %1765 = vsyncpa [#allocation3], 1 }
0x182f   :  { %1766 = vsyncpa [#allocation5], 1 }

</bundles_post_ra>
